<compile_context>
chip_gen: v7x
topology: tpu7x:2x2x1
jax: 0.10.0
libtpu: 0.0.40
codegen_flags: <defaults>
</compile_context>

<pallas_src>
import functools

import jax
import jax.numpy as jnp
from jax.experimental import pallas as pl
from jax.experimental.pallas import tpu as pltpu


def _round_up(x, m):
    return ((x + m - 1) // m) * m


def _focal_loss_kernel(x_ref, t_ref, a_ref, o_ref, *,
                       gamma, n_total, tile_rows, class_axis):
    """One batch tile.  `class_axis` is the axis of x_ref holding the classes.

    x_ref: (TILE, C) if class_axis == 1 else (C, TILE)  -- logits (any float dtype)
    t_ref: (TILE, 1) or (1, TILE) int32                 -- target class ids
    a_ref: (1, C)    or (C, 1)    f32                   -- per-class alpha
    o_ref: (1, 1) f32 in SMEM                           -- running loss sum
    """
    batch_axis = 1 - class_axis

    x = x_ref[...].astype(jnp.float32)
    t = t_ref[...]

    # One-hot target mask built in-kernel from integer ids.
    cls = jax.lax.broadcasted_iota(jnp.int32, x.shape, class_axis)
    mask = (cls == t).astype(jnp.float32)

    # log-softmax at the target class via log-sum-exp (no full softmax array).
    m = jnp.max(x, axis=class_axis, keepdims=True)
    s = jnp.sum(jnp.exp(x - m), axis=class_axis, keepdims=True)
    x_t = jnp.sum(x * mask, axis=class_axis, keepdims=True)
    log_p = x_t - m - jnp.log(s)                 # == log(probs), no underflow
    probs = jnp.exp(log_p)

    alpha_t = jnp.sum(a_ref[...].astype(jnp.float32) * mask,
                      axis=class_axis, keepdims=True)

    one_minus_p = 1.0 - probs
    if gamma == 0.0:
        modulator = jnp.ones_like(one_minus_p)
    elif gamma == 1.0:
        modulator = one_minus_p
    elif gamma == 2.0:
        modulator = one_minus_p * one_minus_p
    else:
        modulator = jnp.power(one_minus_p, jnp.float32(gamma))

    per_row = -alpha_t * modulator * log_p       # (TILE, 1) or (1, TILE)

    # Zero contributions from padded rows (ragged last tile / batch padding).
    row = jax.lax.broadcasted_iota(jnp.int32, per_row.shape, batch_axis)
    row = pl.program_id(0) * tile_rows + row
    per_row = jnp.where(row < n_total, per_row, 0.0)

    @pl.when(pl.program_id(0) == 0)
    def _():
        o_ref[0, 0] = 0.0

    o_ref[0, 0] += jnp.sum(per_row)


def focal_loss(inputs, targets, alpha=None, *, gamma=1.0, size_average=True,
               max_tile_rows=None):
    """inputs: (N, C) float logits; targets: (N,) ints; alpha: (C,), (C,1) or None."""
    n, c = inputs.shape
    if alpha is None:
        alpha = jnp.ones((c,), dtype=jnp.float32)     # matches the PyTorch default
    alpha = jnp.asarray(alpha, jnp.float32).reshape(-1)
    targets = targets.astype(jnp.int32)

    # Layout: keep the big axis on the 128-wide lane dimension.
    classes_on_lanes = c >= 128
    quantum = 8 if classes_on_lanes else 128

    # ~2 MiB per logits block: double-buffered + a few f32 temporaries still
    # fits the v5e 16 MiB scoped-VMEM default and v7x's 64 MiB physical VMEM.
    budget_rows = max(1, (2 * 1024 * 1024) // (c * 4))
    cap = 8192 if max_tile_rows is None else int(max_tile_rows)
    tile = min(cap, budget_rows)
    tile = max(quantum, (tile // quantum) * quantum)
    tile = min(tile, _round_up(n, quantum))

    n_pad = _round_up(n, tile)
    num_tiles = n_pad // tile

    x, t = inputs, targets
    if n_pad != n:
        x = jnp.pad(x, ((0, n_pad - n), (0, 0)))
        t = jnp.pad(t, ((0, n_pad - n),))

    if classes_on_lanes:
        class_axis = 1
        x_arg, t_arg, a_arg = x, t.reshape(n_pad, 1), alpha.reshape(1, c)
        x_spec = pl.BlockSpec((tile, c), lambda i: (i, 0))
        t_spec = pl.BlockSpec((tile, 1), lambda i: (i, 0))
        a_spec = pl.BlockSpec((1, c), lambda i: (0, 0))
    else:
        class_axis = 0
        x_arg, t_arg, a_arg = x.T, t.reshape(1, n_pad), alpha.reshape(c, 1)
        x_spec = pl.BlockSpec((c, tile), lambda i: (0, i))
        t_spec = pl.BlockSpec((1, tile), lambda i: (0, i))
        a_spec = pl.BlockSpec((c, 1), lambda i: (0, 0))

    kernel = functools.partial(
        _focal_loss_kernel,
        gamma=float(gamma), n_total=n, tile_rows=tile, class_axis=class_axis)

    # TODO(synk): on v7x (2 TensorCores) emit per-core partial sums on a
    # "parallel" grid axis instead of this single serial SMEM accumulator.
    out = pl.pallas_call(
        kernel,
        out_shape=jax.ShapeDtypeStruct((1, 1), jnp.float32),
        grid=(num_tiles,),
        in_specs=[x_spec, t_spec, a_spec],
        out_specs=pl.BlockSpec((1, 1), lambda i: (0, 0),
                               memory_space=pltpu.SMEM),
        compiler_params=pltpu.CompilerParams(
            dimension_semantics=("arbitrary",),
            vmem_limit_bytes=32 * 1024 * 1024),
    )(x_arg, t_arg, a_arg)

    total = out[0, 0]
    return total / jnp.float32(n) if size_average else total


def _focal_loss_ref(inputs, targets, alpha, *, gamma=1.0, size_average=True):
    p = jax.nn.softmax(inputs.astype(jnp.float32), axis=1)
    n, c = inputs.shape
    mask = jax.nn.one_hot(targets, c, dtype=jnp.float32)
    probs = jnp.sum(p * mask, axis=1, keepdims=True)
    a = jnp.asarray(alpha, jnp.float32).reshape(-1)[targets].reshape(n, 1)
    batch_loss = -a * jnp.power(1.0 - probs, gamma) * jnp.log(probs)
    return jnp.mean(batch_loss) if size_average else jnp.sum(batch_loss)


if __name__ == "__main__":
    key = jax.random.PRNGKey(0)

    # 1) module-sized demo: C=8, N=16, gamma=1, mean reduction (lane-dense
    #    transposed path, single tile).
    k1, k2, k3, k4, k5, k6 = jax.random.split(key, 6)
    class_num, batch, gamma = 8, 16, 1.0
    logits = jax.random.normal(k1, (batch, class_num), dtype=jnp.float32)
    targets = jax.random.randint(k2, (batch,), 0, class_num, dtype=jnp.int32)
    loss = jax.block_until_ready(focal_loss(logits, targets, gamma=gamma))
    ref = _focal_loss_ref(logits, targets, jnp.ones((class_num, 1), jnp.float32),
                          gamma=gamma, size_average=True)
    assert jnp.allclose(loss, ref, rtol=1e-5, atol=1e-5), (loss, ref)

    # 2) C >= 128 path with ragged batch, gamma=2, sum reduction.
    c2, n2 = 160, 20
    logits2 = jax.random.normal(k3, (n2, c2), dtype=jnp.float32)
    targets2 = jax.random.randint(k4, (n2,), 0, c2, dtype=jnp.int32)
    loss2 = jax.block_until_ready(
        focal_loss(logits2, targets2, gamma=2.0, size_average=False))
    ref2 = _focal_loss_ref(logits2, targets2, jnp.ones((c2, 1), jnp.float32),
                           gamma=2.0, size_average=False)
    assert jnp.allclose(loss2, ref2, rtol=1e-5, atol=1e-5), (loss2, ref2)

    # 3) multi-tile accumulation + ragged last tile + non-integer gamma.
    c3, n3 = 8, 300
    logits3 = jax.random.normal(k5, (n3, c3), dtype=jnp.float32)
    targets3 = jax.random.randint(k6, (n3,), 0, c3, dtype=jnp.int32)
    loss3 = jax.block_until_ready(
        focal_loss(logits3, targets3, gamma=0.5, size_average=True,
                   max_tile_rows=128))
    ref3 = _focal_loss_ref(logits3, targets3, jnp.ones((c3, 1), jnp.float32),
                           gamma=0.5, size_average=True)
    assert jnp.allclose(loss3, ref3, rtol=1e-5, atol=1e-5), (loss3, ref3)

    print("KERNEL_OK")
</pallas_src>

<mosaic_0001>
module attributes {stable_mosaic.version = 11 : i64} {
  func.func @_focal_loss_kernel(%arg0: i32, %arg1: memref<8x128xf32, #tpu.memory_space<vmem>>, %arg2: memref<1x128xi32, #tpu.memory_space<vmem>>, %arg3: memref<8x1xf32, #tpu.memory_space<vmem>>, %arg4: memref<1x1xf32, #tpu.memory_space<smem>>) attributes {dimension_semantics = [#tpu.dimension_semantics<arbitrary>], iteration_bounds = array<i64: 1>, scalar_prefetch = 0 : i64, scratch_operands = 0 : i64, tpu.core_type = #tpu.core_type<tc>, window_params = [{transform_indices = @transform_0, window_bounds = array<i64: 8, 128>}, {transform_indices = @transform_1, window_bounds = array<i64: 1, 128>}, {pipeline_mode = #tpu.pipeline_mode<synchronous>, transform_indices = @transform_2, window_bounds = array<i64: 8, 1>}, {transform_indices = @transform_3, window_bounds = array<i64: 1, 1>}]} {
    %c0 = arith.constant 0 : index
    %c0_0 = arith.constant 0 : index
    %0 = vector.load %arg1[%c0, %c0_0] : memref<8x128xf32, #tpu.memory_space<vmem>>, vector<8x128xf32>
    %c0_1 = arith.constant 0 : index
    %c0_2 = arith.constant 0 : index
    %1 = vector.load %arg2[%c0_1, %c0_2] : memref<1x128xi32, #tpu.memory_space<vmem>>, vector<1x128xi32>
    %2 = tpu.iota {dimensions = array<i32: 0>} : vector<8x128xi32>
    %3 = vector.broadcast %1 : vector<1x128xi32> to vector<8x128xi32>
    %4 = arith.cmpi eq, %2, %3 : vector<8x128xi32>
    %5 = arith.extui %4 : vector<8x128xi1> to vector<8x128xi32>
    %6 = arith.sitofp %5 : vector<8x128xi32> to vector<8x128xf32>
    %cst = arith.constant dense<0xFF800000> : vector<128xf32>
    %7 = vector.multi_reduction <maximumf>, %0, %cst [0] : vector<8x128xf32> to vector<128xf32>
    %8 = vector.shape_cast %7 : vector<128xf32> to vector<1x128xf32>
    %9 = vector.broadcast %8 : vector<1x128xf32> to vector<8x128xf32>
    %10 = arith.subf %0, %9 : vector<8x128xf32>
    %11 = math.exp %10 : vector<8x128xf32>
    %cst_3 = arith.constant dense<0.000000e+00> : vector<128xf32>
    %12 = vector.multi_reduction <add>, %11, %cst_3 [0] : vector<8x128xf32> to vector<128xf32>
    %13 = vector.shape_cast %12 : vector<128xf32> to vector<1x128xf32>
    %14 = arith.mulf %0, %6 : vector<8x128xf32>
    %cst_4 = arith.constant dense<0.000000e+00> : vector<128xf32>
    %15 = vector.multi_reduction <add>, %14, %cst_4 [0] : vector<8x128xf32> to vector<128xf32>
    %16 = vector.shape_cast %15 : vector<128xf32> to vector<1x128xf32>
    %17 = arith.subf %16, %8 : vector<1x128xf32>
    %18 = math.log %13 : vector<1x128xf32>
    %19 = arith.subf %17, %18 : vector<1x128xf32>
    %20 = math.exp %19 : vector<1x128xf32>
    %c0_5 = arith.constant 0 : index
    %c0_6 = arith.constant 0 : index
    %21 = vector.load %arg3[%c0_5, %c0_6] : memref<8x1xf32, #tpu.memory_space<vmem>>, vector<8x1xf32>
    %22 = vector.broadcast %21 : vector<8x1xf32> to vector<8x128xf32>
    %23 = arith.mulf %22, %6 : vector<8x128xf32>
    %cst_7 = arith.constant dense<0.000000e+00> : vector<128xf32>
    %24 = vector.multi_reduction <add>, %23, %cst_7 [0] : vector<8x128xf32> to vector<128xf32>
    %25 = vector.shape_cast %24 : vector<128xf32> to vector<1x128xf32>
    %cst_8 = arith.constant 1.000000e+00 : f32
    %26 = vector.broadcast %cst_8 : f32 to vector<1x128xf32>
    %27 = arith.subf %26, %20 : vector<1x128xf32>
    %cst_9 = arith.constant 0.000000e+00 : f32
    %28 = vector.broadcast %cst_9 : f32 to vector<1x128xf32>
    %29 = arith.subf %28, %25 : vector<1x128xf32>
    %30 = arith.mulf %29, %27 : vector<1x128xf32>
    %31 = arith.mulf %30, %19 : vector<1x128xf32>
    %32 = tpu.iota {dimensions = array<i32: 1>} : vector<1x128xi32>
    %c128_i32 = arith.constant 128 : i32
    %33 = arith.muli %arg0, %c128_i32 : i32
    %34 = vector.broadcast %33 : i32 to vector<1x128xi32>
    %35 = arith.addi %34, %32 : vector<1x128xi32>
    %c16_i32 = arith.constant 16 : i32
    %36 = vector.broadcast %c16_i32 : i32 to vector<1x128xi32>
    %37 = arith.cmpi slt, %35, %36 : vector<1x128xi32>
    %cst_10 = arith.constant 0.000000e+00 : f32
    %38 = vector.broadcast %cst_10 : f32 to vector<1x128xf32>
    %39 = arith.select %37, %31, %38 : vector<1x128xi1>, vector<1x128xf32>
    %c0_i32 = arith.constant 0 : i32
    %40 = arith.cmpi eq, %arg0, %c0_i32 : i32
    %41 = arith.extui %40 : i1 to i32
    %c0_i32_11 = arith.constant 0 : i32
    %42 = arith.cmpi ne, %41, %c0_i32_11 : i32
    scf.if %42 {
      %cst_17 = arith.constant 0.000000e+00 : f32
      %c0_18 = arith.constant 0 : index
      %c0_19 = arith.constant 0 : index
      %50 = memref.load %arg4[%c0_18, %c0_19] : memref<1x1xf32, #tpu.memory_space<smem>>
      memref.store %cst_17, %arg4[%c0_18, %c0_19] : memref<1x1xf32, #tpu.memory_space<smem>>
    } else {
    }
    %c0_12 = arith.constant 0 : index
    %c0_13 = arith.constant 0 : index
    %43 = memref.load %arg4[%c0_12, %c0_13] : memref<1x1xf32, #tpu.memory_space<smem>>
    %44 = vector.shape_cast %39 : vector<1x128xf32> to vector<1x1x128xf32>
    %cst_14 = arith.constant dense<0.000000e+00> : vector<1xf32>
    %45 = vector.multi_reduction <add>, %44, %cst_14 [1, 2] : vector<1x1x128xf32> to vector<1xf32>
    %46 = vector.shape_cast %45 : vector<1xf32> to vector<1x1x1xf32>
    %47 = vector.extract %46[0, 0, 0] : f32 from vector<1x1x1xf32>
    %48 = arith.addf %43, %47 : f32
    %c0_15 = arith.constant 0 : index
    %c0_16 = arith.constant 0 : index
    %49 = memref.load %arg4[%c0_15, %c0_16] : memref<1x1xf32, #tpu.memory_space<smem>>
    memref.store %48, %arg4[%c0_15, %c0_16] : memref<1x1xf32, #tpu.memory_space<smem>>
    return
  }
  func.func @transform_0(%arg0: i32) -> (i32, i32) {
    %c0_i32 = arith.constant 0 : i32
    %c0_i32_0 = arith.constant 0 : i32
    return %c0_i32, %arg0 : i32, i32
  }
  func.func @transform_1(%arg0: i32) -> (i32, i32) {
    %c0_i32 = arith.constant 0 : i32
    %c0_i32_0 = arith.constant 0 : i32
    return %c0_i32, %arg0 : i32, i32
  }
  func.func @transform_2(%arg0: i32) -> (i32, i32) {
    %c0_i32 = arith.constant 0 : i32
    %c0_i32_0 = arith.constant 0 : i32
    %c0_i32_1 = arith.constant 0 : i32
    return %c0_i32, %c0_i32_0 : i32, i32
  }
  func.func @transform_3(%arg0: i32) -> (i32, i32) {
    %c0_i32 = arith.constant 0 : i32
    %c0_i32_0 = arith.constant 0 : i32
    %c0_i32_1 = arith.constant 0 : i32
    return %c0_i32, %c0_i32_0 : i32, i32
  }
}

</mosaic_0001>

<bundles_post_ra>
// kernel: tpu_custom_call.1
= control target key start
LH: loop header
LB: loop body
LE: loop exit
PB: predicated region body
PF: predicated region fallthrough
CT: control target
= control target key end

     0   :  { %v139_v1 = vmov 0   ;;  %s183_s0 = inlined_call_operand.vmem [shape: f32[8,128], index: 0, kind: input, shape index: {}]   ;;  %s184_s1 = inlined_call_operand.vmem [shape: s32[1,128], index: 1, kind: input, shape index: {}]   ;;  %s185_s2 = inlined_call_operand.vmem [shape: f32[8,1], index: 2, kind: input, shape index: {}]   ;;  %s186_s3 = inlined_call_operand.hbm [shape: f32[1,1], index: 3, kind: output, shape index: {}]  }
   0x1   :  { %v54_v0 = vld [vmem:[%s185_s2] sm:$0xff]  ;;  %120 = vset.pattern.permute.xlu0 %v139_v1 }
   0x2   :  { %8 = vsyncpa [#allocation3], 0  ;;  %57 = vperm.xlu0 %120, %v54_v0   ;;  %v15_v2 = vld [vmem:[%s183_s0] sm:$0xff]  ;;  %v17_v11 = vlaneseq  ;;  %v140_v17 = vmov 0.0   ;;  %vm85_vm2 = vcmask 1040384   ;;  %s127_s18 = scalar_lea.hbm %s186_s3, 16 }
   0x3   :  { %v26_v3 = vrot.slane %v15_v2, 4  ;;  %v112_v14 = vld [vmem:[%s184_s1] ss:$0 sm:$0xff]  ;;  %p128_p0 = scmp.ne.s32.totalorder %s186_s3, %s127_s18  ;;  %p131_p1 = scmp.lt.u32.totalorder %s127_s18, %s186_s3 }
   0x4   :  { %v18_v13 = vshrl.u32 %v17_v11, 7  ;;  %v72_v45 = vand.u32 127, %v17_v11 }
   0x5   :  { %v27_v4 = vmax.f32 %v15_v2, %v26_v3  ;;  %p133_p2 = pnand %p131_p1, %p128_p0 }
   0x6   :  { %vm23_vm0 = vcmp.eq.s32.totalorder %v18_v13, %v112_v14  ;;  %vm76_vm1 = vcmp.lt.s32.totalorder %v72_v45, 16 }
   0x7   :  { %v28_v5 = vrot.slane %v27_v4, 2  ;;  %v113_v18 = vsel %vm23_vm0, 1.0, %v140_v17 }
   0x8   :  { %v41_v20 = vmul.f32 %v113_v18, %v15_v2 }
   0x9   :  { %v29_v6 = vmax.f32 %v27_v4, %v28_v5 }
   0xa   :  { %v42_v22 = vrot.slane %v41_v20, 4 }
   0xb   :  { %v30_v7 = vrot.slane %v29_v6, 1 }
   0xc   :  { %v43_v24 = vadd.f32 %v42_v22, %v41_v20 }
   0xd   :  { %v31_v8 = vmax.f32 %v29_v6, %v30_v7 }
   0xe   :  { %v44_v26 = vrot.slane %v43_v24, 2 }
   0xf   :  { %v32_v9 = vsub.f32 %v15_v2, %v31_v8 }
  0x10   :  { %v45_v27 = vadd.f32 %v44_v26, %v43_v24 }
  0x11   :  { %v33_v10 = vmul.f32 1.442695, %v32_v9 }
  0x12   :  { %v46_v28 = vrot.slane %v45_v27, 1 }
  0x13   :  { %121 = vpow2.f32 %v33_v10 }
  0x14   :  { %v47_v29 = vadd.f32 %v46_v28, %v45_v27 }
  0x16   :  { %v48_v31 = vsub.f32 %v47_v29, %v31_v8 }
  0x1d   :  { %v122_v12 = vpop.eup %121 }
  0x1e   :  { %v35_v15 = vrot.slane %v122_v12, 4 }
  0x20   :  { %v36_v16 = vadd.f32 %v122_v12, %v35_v15 }
  0x22   :  { %v37_v19 = vrot.slane %v36_v16, 2 }
  0x24   :  { %v38_v21 = vadd.f32 %v37_v19, %v36_v16 }
  0x26   :  { %v39_v23 = vrot.slane %v38_v21, 1 }
  0x28   :  { %v40_v25 = vadd.f32 %v39_v23, %v38_v21 }
  0x2a   :  { %123 = vlog2.f32 %v40_v25 }
  0x34   :  { %v124_v30 = vpop.eup %123 }
  0x35   :  { %v50_v32 = vmul.f32 0.6931472, %v124_v30 }
  0x37   :  { %v51_v33 = vsub.f32 %v48_v31, %v50_v32 }
  0x39   :  { %v52_v34 = vmul.f32 1.442695, %v51_v33 }
  0x3b   :  { %125 = vpow2.f32 %v52_v34 }
  0x45   :  { %v126_v41 = vpop.eup %125 }
  0x46   :  { %v67_v44 = vsub.f32 1.0, %v126_v41 }
  0x81   :  { %v58_v35 = vpop.permute.xlu0 %57 }
  0x82   :  { %v60_v36 = vmul.f32 %v113_v18, %v58_v35 }
  0x84   :  { %v61_v37 = vrot.slane %v60_v36, 4 }
  0x86   :  { %v62_v38 = vadd.f32 %v61_v37, %v60_v36 }
  0x88   :  { %v63_v39 = vrot.slane %v62_v38, 2 }
  0x8a   :  { %v64_v40 = vadd.f32 %v63_v39, %v62_v38 }
  0x8c   :  { %v65_v42 = vrot.slane %v64_v40, 1 }
  0x8e   :  { %v66_v43 = vadd.f32 %v65_v42, %v64_v40 }
  0x90   :  { %v68_v46 = vsub.f32 0.0, %v66_v43 }
  0x92   :  { %v69_v47 = vmul.f32 %v68_v46, %v67_v44 }
  0x94   :  { %v70_v48 = vmul.f32 %v69_v47, %v51_v33 }
  0x96   :  { %v77_v49 = vsel %vm76_vm1, %v70_v48, 0.0 }
  0x97   :  { %v86_v50 = vsel %vm85_vm2, %v77_v49, 0.0 }
  0x98   :  { %87 = vadd.xlane.f32.xlu0 %v86_v50 }
 0x125   :  { %v88_v51 = vpop.xlane.xlu0 %87 }
 0x126   :  { %v89_v52 = vrot.slane %v88_v51, 4 }
 0x128   :  { %v90_v53 = vadd.f32 %v89_v52, %v88_v51 }
 0x12a   :  { %v91_v54 = vrot.slane %v90_v53, 2 }
 0x12c   :  { %v92_v55 = vadd.f32 %v91_v54, %v90_v53 }
 0x12e   :  { %v93_v56 = vrot.slane %v92_v55, 1 }
 0x130   :  { %v94_v57 = vadd.f32 %v93_v56, %v92_v55 }
 0x132   :  { %114 = vpush %v94_v57 }
 0x163   :  { %s115_s0 = spop %114 }
 0x164   :  { %98 = sst [smem:[#allocation2]] %s115_s0 }
 0x165   :  { %136 = shalt.err (!%p133_p2)
}
 0x166   :  { %s141_s23 = smov [#allocation2]  }
 0x167   :  { %106 = dma.smem_to_hbm %s141_s23, 16, %s186_s3, [#allocation3]  }
 0x168   :  { %137 = dma.done.wait [#allocation3], 16  }
 0x169   :  { %138 = vsyncadd [#allocation3], 4294967280 }
 0x16a   :  { %110 = sfence }
 0x16b   :  { %111 = vsyncpa [#allocation3], 1 }

</bundles_post_ra>
